<compile_context>
chip_gen: v7x
topology: tpu7x:2x2x1
jax: 0.10.0
libtpu: 0.0.40
codegen_flags: <defaults>
</compile_context>

<pallas_src>
import jax
import jax.numpy as jnp
from jax.experimental import pallas as pl
from jax.experimental.pallas import tpu as pltpu

LATENT_DIM = 2
HIDDEN_DIMS = [128, 256]
INPUT_DIM = 2          # real output width of the generator
OUT_PAD = 128          # lane-dense padded output width stored by the kernel
DEFAULT_TILE_B = 1024  # batch tile (amortizes per-step overhead, fills MXU)


def _round_up(x, m):
    return (x + m - 1) // m * m


def _generator_kernel(z_ref, p1_ref, p2_ref, p3_ref, o_ref):
    """One batch tile of the full 3-layer MLP.

    Packed parameter layout (weights stored as (in, out), bias as last row):
      p1: (LATENT_DIM + 1, 128)    rows 0..1   = w1, row 2   = b1
      p2: (128 + 1,        256)    rows 0..127 = w2, row 128 = b2
      p3: (256 + 1,     OUT_PAD)   rows 0..255 = w3 (cols >= 2 are zero),
                                   row 256 = b3 (padded with zeros)
    """
    z = z_ref[...]                                           # (TILE_B, 2) f32

    # ---- Layer 1 (K=2): two broadcast FMAs on the VPU, skip the MXU. ----
    h1 = (z[:, 0:1] * p1_ref[0:1, :]
          + z[:, 1:2] * p1_ref[1:2, :]
          + p1_ref[2:3, :])
    h1 = jnp.maximum(h1, 0.0)                                # (TILE_B, 128)

    # ---- Layer 2: (TILE_B, 128) @ (128, 256) on the MXU, bias + ReLU. ----
    h2 = jnp.dot(h1, p2_ref[0:HIDDEN_DIMS[0], :],
                 preferred_element_type=jnp.float32)
    h2 = jnp.maximum(h2 + p2_ref[HIDDEN_DIMS[0]:HIDDEN_DIMS[0] + 1, :], 0.0)

    # ---- Layer 3: (TILE_B, 256) @ (256, 128) lane-dense padded output. ----
    out = jnp.dot(h2, p3_ref[0:HIDDEN_DIMS[1], :],
                  preferred_element_type=jnp.float32)
    out = out + p3_ref[HIDDEN_DIMS[1]:HIDDEN_DIMS[1] + 1, :]
    o_ref[...] = out.astype(o_ref.dtype)


def generator_forward(z, packed_params, *, tile_b=DEFAULT_TILE_B):
    """Full Generator forward pass as a single gridded Pallas call."""
    p1, p2, p3 = packed_params
    z = z.astype(jnp.float32)
    B = z.shape[0]

    # Pick a batch tile: multiple of 8 sublanes, no bigger than the padded B.
    tile_b = _round_up(min(tile_b, _round_up(B, 8)), 8)
    b_pad = _round_up(B, tile_b)
    if b_pad != B:
        z = jnp.pad(z, ((0, b_pad - B), (0, 0)))
    num_tiles = b_pad // tile_b

    flops = 2 * b_pad * (LATENT_DIM * HIDDEN_DIMS[0]
                         + HIDDEN_DIMS[0] * HIDDEN_DIMS[1]
                         + HIDDEN_DIMS[1] * INPUT_DIM)
    bytes_accessed = 4 * (z.size + p1.size + p2.size + p3.size
                          + b_pad * OUT_PAD)

    out_padded = pl.pallas_call(
        _generator_kernel,
        out_shape=jax.ShapeDtypeStruct((b_pad, OUT_PAD), jnp.float32),
        grid=(num_tiles,),
        in_specs=[
            # z: one batch tile per grid step (double-buffered by Pallas).
            pl.BlockSpec((tile_b, LATENT_DIM), lambda i: (i, 0)),
            # Packed params: constant index_map -> fetched once, VMEM-resident.
            pl.BlockSpec(p1.shape, lambda i: (0, 0)),
            pl.BlockSpec(p2.shape, lambda i: (0, 0)),
            pl.BlockSpec(p3.shape, lambda i: (0, 0)),
        ],
        out_specs=pl.BlockSpec((tile_b, OUT_PAD), lambda i: (i, 0)),
        compiler_params=pltpu.CompilerParams(
            dimension_semantics=("parallel",)),
        cost_estimate=pl.CostEstimate(
            flops=flops, transcendentals=0, bytes_accessed=bytes_accessed),
    )(z, p1, p2, p3)

    # Un-pad: drop padded batch rows and the 126 zero output lanes.
    return out_padded[:B, :INPUT_DIM]


def init_params(key):
    """PyTorch-default-like init: uniform(-1/sqrt(fan_in), 1/sqrt(fan_in)).

    Weights are stored as (in, out) so the kernel computes x @ W + b,
    matching PyTorch's x @ weight.T + bias.
    """
    dims = [LATENT_DIM, HIDDEN_DIMS[0], HIDDEN_DIMS[1], INPUT_DIM]
    params = []
    for i in range(3):
        fan_in, fan_out = dims[i], dims[i + 1]
        key, kw, kb = jax.random.split(key, 3)
        bound = 1.0 / jnp.sqrt(fan_in)
        w = jax.random.uniform(kw, (fan_in, fan_out), jnp.float32,
                               minval=-bound, maxval=bound)
        b = jax.random.uniform(kb, (1, fan_out), jnp.float32,
                               minval=-bound, maxval=bound)
        params.append((w, b))
    return params


def pack_params(params):
    """Pack (w, b) per layer into one buffer; pad layer 3 to lane-dense 128."""
    (w1, b1), (w2, b2), (w3, b3) = params
    p1 = jnp.concatenate([w1, b1], axis=0)                       # (3, 128)
    p2 = jnp.concatenate([w2, b2], axis=0)                       # (129, 256)
    w3p = jnp.zeros((HIDDEN_DIMS[1], OUT_PAD),
                    jnp.float32).at[:, :INPUT_DIM].set(w3)
    b3p = jnp.zeros((1, OUT_PAD), jnp.float32).at[:, :INPUT_DIM].set(b3)
    p3 = jnp.concatenate([w3p, b3p], axis=0)                     # (257, 128)
    return p1, p2, p3


def _reference_forward(z, params):
    (w1, b1), (w2, b2), (w3, b3) = params
    h1 = jnp.maximum(z @ w1 + b1, 0.0)
    h2 = jnp.maximum(h1 @ w2 + b2, 0.0)
    return h2 @ w3 + b3


if __name__ == "__main__":
    key = jax.random.PRNGKey(0)
    params = init_params(key)
    packed = pack_params(params)

    # Test 1: small aligned batch, single tile.
    key, k1 = jax.random.split(key)
    z1 = jax.random.normal(k1, (8, LATENT_DIM), dtype=jnp.float32)
    out1 = jax.block_until_ready(generator_forward(z1, packed))
    ref1 = _reference_forward(z1, params)
    assert out1.shape == (8, INPUT_DIM)
    assert jnp.allclose(out1, ref1, atol=1e-5, rtol=1e-5)

    # Test 2: ragged batch + multi-tile grid (exercises batch padding and
    # the resident-weight constant index_map across grid steps).
    key, k2 = jax.random.split(key)
    z2 = jax.random.normal(k2, (19, LATENT_DIM), dtype=jnp.float32)
    out2 = jax.block_until_ready(generator_forward(z2, packed, tile_b=8))
    ref2 = _reference_forward(z2, params)
    assert out2.shape == (19, INPUT_DIM)
    assert jnp.allclose(out2, ref2, atol=1e-5, rtol=1e-5)

    print("KERNEL_OK")
</pallas_src>

<mosaic_0001>
module attributes {stable_mosaic.version = 11 : i64} {
  func.func @_generator_kernel(%arg0: i32, %arg1: memref<8x2xf32, #tpu.memory_space<vmem>>, %arg2: memref<3x128xf32, #tpu.memory_space<vmem>>, %arg3: memref<129x256xf32, #tpu.memory_space<vmem>>, %arg4: memref<257x128xf32, #tpu.memory_space<vmem>>, %arg5: memref<8x128xf32, #tpu.memory_space<vmem>>) attributes {dimension_semantics = [#tpu.dimension_semantics<parallel>], iteration_bounds = array<i64: 1>, scalar_prefetch = 0 : i64, scratch_operands = 0 : i64, tpu.core_type = #tpu.core_type<tc>, window_params = [{transform_indices = @transform_0, window_bounds = array<i64: 8, 2>}, {pipeline_mode = #tpu.pipeline_mode<synchronous>, transform_indices = @transform_1, window_bounds = array<i64: 3, 128>}, {pipeline_mode = #tpu.pipeline_mode<synchronous>, transform_indices = @transform_2, window_bounds = array<i64: 129, 256>}, {pipeline_mode = #tpu.pipeline_mode<synchronous>, transform_indices = @transform_3, window_bounds = array<i64: 257, 128>}, {transform_indices = @transform_4, window_bounds = array<i64: 8, 128>}]} {
    %c0 = arith.constant 0 : index
    %c0_0 = arith.constant 0 : index
    %0 = vector.load %arg1[%c0, %c0_0] : memref<8x2xf32, #tpu.memory_space<vmem>>, vector<8x2xf32>
    %1 = vector.extract_strided_slice %0 {offsets = [0, 0], sizes = [8, 1], strides = [1, 1]} : vector<8x2xf32> to vector<8x1xf32>
    %c0_1 = arith.constant 0 : index
    %c0_2 = arith.constant 0 : index
    %2 = vector.load %arg2[%c0_1, %c0_2] : memref<3x128xf32, #tpu.memory_space<vmem>>, vector<1x128xf32>
    %3 = vector.broadcast %1 : vector<8x1xf32> to vector<8x128xf32>
    %4 = vector.broadcast %2 : vector<1x128xf32> to vector<8x128xf32>
    %5 = arith.mulf %3, %4 : vector<8x128xf32>
    %6 = vector.extract_strided_slice %0 {offsets = [0, 1], sizes = [8, 1], strides = [1, 1]} : vector<8x2xf32> to vector<8x1xf32>
    %c1 = arith.constant 1 : index
    %c0_3 = arith.constant 0 : index
    %7 = vector.load %arg2[%c1, %c0_3] : memref<3x128xf32, #tpu.memory_space<vmem>>, vector<1x128xf32>
    %8 = vector.broadcast %6 : vector<8x1xf32> to vector<8x128xf32>
    %9 = vector.broadcast %7 : vector<1x128xf32> to vector<8x128xf32>
    %10 = arith.mulf %8, %9 : vector<8x128xf32>
    %11 = arith.addf %5, %10 : vector<8x128xf32>
    %c2 = arith.constant 2 : index
    %c0_4 = arith.constant 0 : index
    %12 = vector.load %arg2[%c2, %c0_4] : memref<3x128xf32, #tpu.memory_space<vmem>>, vector<1x128xf32>
    %13 = vector.broadcast %12 : vector<1x128xf32> to vector<8x128xf32>
    %14 = arith.addf %11, %13 : vector<8x128xf32>
    %cst = arith.constant 0.000000e+00 : f32
    %15 = vector.broadcast %cst : f32 to vector<8x128xf32>
    %16 = arith.maximumf %14, %15 : vector<8x128xf32>
    %c0_5 = arith.constant 0 : index
    %c0_6 = arith.constant 0 : index
    %17 = vector.load %arg3[%c0_5, %c0_6] : memref<129x256xf32, #tpu.memory_space<vmem>>, vector<128x256xf32>
    %cst_7 = arith.constant dense<0.000000e+00> : vector<8x256xf32>
    %18 = tpu.matmul %16, %17, %cst_7 {dimension_numbers = #tpu.dot_dimension_numbers<[1], [0], [0], [1], [0, 0, 1, 1], [], []>} : vector<8x128xf32>, vector<128x256xf32>, vector<8x256xf32> -> vector<8x256xf32>
    %c128 = arith.constant 128 : index
    %c0_8 = arith.constant 0 : index
    %19 = vector.load %arg3[%c128, %c0_8] : memref<129x256xf32, #tpu.memory_space<vmem>>, vector<1x256xf32>
    %20 = vector.broadcast %19 : vector<1x256xf32> to vector<8x256xf32>
    %21 = arith.addf %18, %20 : vector<8x256xf32>
    %cst_9 = arith.constant 0.000000e+00 : f32
    %22 = vector.broadcast %cst_9 : f32 to vector<8x256xf32>
    %23 = arith.maximumf %21, %22 : vector<8x256xf32>
    %c0_10 = arith.constant 0 : index
    %c0_11 = arith.constant 0 : index
    %24 = vector.load %arg4[%c0_10, %c0_11] : memref<257x128xf32, #tpu.memory_space<vmem>>, vector<256x128xf32>
    %cst_12 = arith.constant dense<0.000000e+00> : vector<8x128xf32>
    %25 = tpu.matmul %23, %24, %cst_12 {dimension_numbers = #tpu.dot_dimension_numbers<[1], [0], [0], [1], [0, 0, 1, 1], [], []>} : vector<8x256xf32>, vector<256x128xf32>, vector<8x128xf32> -> vector<8x128xf32>
    %c256 = arith.constant 256 : index
    %c0_13 = arith.constant 0 : index
    %26 = vector.load %arg4[%c256, %c0_13] : memref<257x128xf32, #tpu.memory_space<vmem>>, vector<1x128xf32>
    %27 = vector.broadcast %26 : vector<1x128xf32> to vector<8x128xf32>
    %28 = arith.addf %25, %27 : vector<8x128xf32>
    %c0_14 = arith.constant 0 : index
    %c0_15 = arith.constant 0 : index
    %29 = vector.load %arg5[%c0_14, %c0_15] : memref<8x128xf32, #tpu.memory_space<vmem>>, vector<8x128xf32>
    tpu.vector_store %arg5[%c0_14, %c0_15], %28 {strides = array<i32>} : memref<8x128xf32, #tpu.memory_space<vmem>>, vector<8x128xf32>,
    return
  }
  func.func @transform_0(%arg0: i32) -> (i32, i32) {
    %c0_i32 = arith.constant 0 : i32
    %c0_i32_0 = arith.constant 0 : i32
    return %arg0, %c0_i32 : i32, i32
  }
  func.func @transform_1(%arg0: i32) -> (i32, i32) {
    %c0_i32 = arith.constant 0 : i32
    %c0_i32_0 = arith.constant 0 : i32
    %c0_i32_1 = arith.constant 0 : i32
    return %c0_i32, %c0_i32_0 : i32, i32
  }
  func.func @transform_2(%arg0: i32) -> (i32, i32) {
    %c0_i32 = arith.constant 0 : i32
    %c0_i32_0 = arith.constant 0 : i32
    %c0_i32_1 = arith.constant 0 : i32
    return %c0_i32, %c0_i32_0 : i32, i32
  }
  func.func @transform_3(%arg0: i32) -> (i32, i32) {
    %c0_i32 = arith.constant 0 : i32
    %c0_i32_0 = arith.constant 0 : i32
    %c0_i32_1 = arith.constant 0 : i32
    return %c0_i32, %c0_i32_0 : i32, i32
  }
  func.func @transform_4(%arg0: i32) -> (i32, i32) {
    %c0_i32 = arith.constant 0 : i32
    %c0_i32_0 = arith.constant 0 : i32
    return %arg0, %c0_i32 : i32, i32
  }
}

</mosaic_0001>

<bundles_post_ra>
// kernel: tpu_custom_call.1
= control target key start
LH: loop header
LB: loop body
LE: loop exit
PB: predicated region body
PF: predicated region fallthrough
CT: control target
= control target key end

     0   :  { %9 = vsyncpa [#allocation3], 0  ;;  %s588_s0 = inlined_call_operand.vmem [shape: f32[8,2], index: 0, kind: input, shape index: {}]   ;;  %s589_s1 = inlined_call_operand.vmem [shape: f32[3,128], index: 1, kind: input, shape index: {}]   ;;  %s590_s2 = inlined_call_operand.hbm [shape: f32[129,256], index: 2, kind: input, shape index: {}]   ;;  %s591_s3 = inlined_call_operand.hbm [shape: f32[257,128], index: 3, kind: input, shape index: {}]   ;;  %s592_s4 = inlined_call_operand.hbm [shape: f32[8,128], index: 4, kind: output, shape index: {}]  }
   0x1   :  { %10 = vsyncpa [#allocation6], 0 }
   0x2   :  { %11 = vsyncpa [#allocation4], 0  ;;  %s505_s15 = smov [#allocation2]   ;;  %s433_s19 = scalar_lea.hbm %s590_s2, 4352 }
   0x3   :  { %s21_s16 = sshll.u32 %s505_s15, 4  ;;  %p434_p0 = scmp.ne.s32.totalorder %s590_s2, %s433_s19  ;;  %s22_s16 = int_to_ptr.vmem [resolvable:$true] %s21_s16 }
   0x4   :  { %p437_p1 = scmp.lt.u32.totalorder %s433_s19, %s590_s2 }
   0x6   :  { %p439_p2 = pnand %p437_p1, %p434_p0 }
   0x8   :  { %442 = shalt.err (!%p439_p2)
}
   0x9   :  { %s443_s24 = scalar_lea.vmem %s22_s16, 4352  ;;  %p448_p4 = scmp.lt.s32.totalorder %s22_s16, %s22_s16 }
   0xa   :  { %p444_p3 = scmp.ne.s32.totalorder %s22_s16, %s443_s24  ;;  %p449_p5 = scmp.lt.s32.totalorder %s443_s24, %s443_s24 }
   0xc   :  { %p450_p6 = por %p449_p5, %p448_p4 }
   0xe   :  { %p451_p7 = pnand %p450_p6, %p444_p3 }
  0x10   :  { %454 = shalt.err (!%p451_p7)
}
  0x11   :  { %s506_s25 = smov 256   ;;  %s507_s26 = smov 16  }
  0x12   :  { %27 = dma.hbm_to_vmem [thread:$0]  %s590_s2, 4352, %s22_s16, [#allocation3], %s506_s25, %s506_s25, %s507_s26  }
  0x13   :  { %s508_s29 = smov [#allocation5]   ;;  %s455_s7 = scalar_lea.hbm %s591_s3, 4224 }
  0x14   :  { %s33_s30 = sshll.u32 %s508_s29, 4  ;;  %p456_p8 = scmp.ne.s32.totalorder %s591_s3, %s455_s7  ;;  %s34_s30 = int_to_ptr.vmem [resolvable:$true] %s33_s30 }
  0x15   :  { %p459_p9 = scmp.lt.u32.totalorder %s455_s7, %s591_s3 }
  0x17   :  { %p461_p10 = pnand %p459_p9, %p456_p8 }
  0x19   :  { %464 = shalt.err (!%p461_p10)
}
  0x1a   :  { %s465_s12 = scalar_lea.vmem %s34_s30, 4224  ;;  %p470_p12 = scmp.lt.s32.totalorder %s34_s30, %s34_s30 }
  0x1b   :  { %p466_p11 = scmp.ne.s32.totalorder %s34_s30, %s465_s12  ;;  %p471_p13 = scmp.lt.s32.totalorder %s465_s12, %s465_s12 }
  0x1d   :  { %p472_p0 = por %p471_p13, %p470_p12 }
  0x1f   :  { %p473_p1 = pnand %p472_p0, %p466_p11 }
  0x21   :  { %476 = shalt.err (!%p473_p1)
}
  0x22   :  { %s509_s2 = smov 128   ;;  %s510_s13 = smov 8  }
  0x23   :  { %39 = dma.hbm_to_vmem [thread:$0]  %s591_s3, 4224, %s34_s30, [#allocation6], %s509_s2, %s509_s2, %s510_s13  }
  0x24   :  { %499 = dma.done.wait [#allocation3], 4352  }
  0x25   :  { %500 = vsyncadd [#allocation3], 4294962944 }
  0x26   :  { %501 = dma.done.wait [#allocation6], 4224  }
  0x27   :  { %502 = vsyncadd [#allocation6], 4294963072  ;;  %v511_v0 = vmov 0   ;;  %v46_v1 = vld [vmem:[%s588_s0] sm:$0xff]  ;;  %v77_v2 = vld [vmem:[#allocation2 + $0x8] sm:$0xff]  ;;  %v512_v16 = vmov 1  }
  0x28   :  { %431 = vset.pattern.permute.xlu0 %v511_v0  ;;  %v79_v3 = vld [vmem:[#allocation2 + $0x18] sm:$0xff]  ;;  %v76_v5 = vld [vmem:[#allocation2] sm:$0xff]  ;;  %v78_v6 = vld [vmem:[#allocation2 + $0x10] sm:$0xff]  ;;  %v513_v26 = vmov 0.0  }
  0x29   :  { %50 = vperm.xlu0 %431, %v46_v1   ;;  %v357_v4 = vpack.c.bf16 %v79_v3, %v77_v2  ;;  %v81_v7 = vld [vmem:[#allocation2 + $0x28] sm:$0xff]  ;;  %v359_v8 = vpack.c.bf16 %v78_v6, %v76_v5  ;;  %v83_v9 = vld [vmem:[#allocation2 + $0x38] sm:$0xff]  ;;  %v80_v10 = vld [vmem:[#allocation2 + $0x20] sm:$0xff]  ;;  %185 = vmatprep.mubr.f32.mxu0 %v513_v26 }
  0x2a   :  { %v82_v11 = vld [vmem:[#allocation2 + $0x30] sm:$0xff]  ;;  %v361_v12 = vpack.c.bf16 %v83_v9, %v81_v7  ;;  %v85_v13 = vld [vmem:[#allocation2 + $0x48] sm:$0xff]  ;;  %v87_v14 = vld [vmem:[#allocation2 + $0x58] sm:$0xff] }
  0x2b   :  { %358 = vmatprep.subr.bf16.mxu0 %v357_v4  ;;  %v363_v15 = vpack.c.bf16 %v82_v11, %v80_v10  ;;  %v365_v17 = vpack.c.bf16 %v87_v14, %v85_v13  ;;  %v84_v18 = vld [vmem:[#allocation2 + $0x40] sm:$0xff]  ;;  %v86_v19 = vld [vmem:[#allocation2 + $0x50] sm:$0xff]  ;;  %v89_v20 = vld [vmem:[#allocation2 + $0x68] sm:$0xff] }
  0x2c   :  { %360 = vmatpush1.bf16.msra.mxu0 %v359_v8  ;;  %v91_v21 = vld [vmem:[#allocation2 + $0x78] sm:$0xff]  ;;  %v367_v22 = vpack.c.bf16 %v86_v19, %v84_v18  ;;  %v88_v24 = vld [vmem:[#allocation2 + $0x60] sm:$0xff]  ;;  %v90_v25 = vld [vmem:[#allocation2 + $0x70] sm:$0xff] }
  0x2d   :  { %432 = vset.pattern.permute.xlu0 %v512_v16  ;;  %362 = vmatprep.subr.bf16.mxu0 %v361_v12  ;;  %v369_v23 = vpack.c.bf16 %v91_v21, %v89_v20  ;;  %v93_v27 = vld [vmem:[#allocation2 + $0x88] sm:$0xff]  ;;  %v95_v28 = vld [vmem:[#allocation2 + $0x98] sm:$0xff]  ;;  %v371_v29 = vpack.c.bf16 %v90_v25, %v88_v24  ;;  %v92_v30 = vld [vmem:[#allocation2 + $0x80] sm:$0xff] }
  0x2e   :  { %60 = vperm.xlu0 %432, %v46_v1   ;;  %v373_v31 = vpack.c.bf16 %v95_v28, %v93_v27  ;;  %v94_v32 = vld [vmem:[#allocation2 + $0x90] sm:$0xff]  ;;  %v97_v33 = vld [vmem:[#allocation2 + $0xa8] sm:$0xff]  ;;  %v99_v34 = vld [vmem:[#allocation2 + $0xb8] sm:$0xff] }
  0x2f   :  { %v210_v35 = vld [vmem:[#allocation5 + $0x80] sm:$0xff]  ;;  %v211_v36 = vld [vmem:[#allocation5 + $0x88] sm:$0xff]  ;;  %v212_v40 = vld [vmem:[#allocation5 + $0x90] sm:$0xff]  ;;  %v375_v42 = vpack.c.bf16 %v94_v32, %v92_v30  ;;  %v377_v48 = vpack.c.bf16 %v99_v34, %v97_v33 }
  0x30   :  { %364 = vmatpush1.bf16.msra.mxu0 %v363_v15  ;;  %v194_v37 = vld [vmem:[#allocation5] sm:$0xff]  ;;  %v389_v38 = vpack.c.bf16 %v211_v36, %v210_v35  ;;  %v195_v39 = vld [vmem:[#allocation5 + $0x8] sm:$0xff]  ;;  %v213_v41 = vld [vmem:[#allocation5 + $0x98] sm:$0xff] }
  0x31   :  { %366 = vmatprep.subr.bf16.mxu0 %v365_v17  ;;  %v391_v43 = vpack.c.bf16 %v195_v39, %v194_v37  ;;  %v393_v44 = vpack.c.bf16 %v213_v41, %v212_v40  ;;  %v196_v45 = vld [vmem:[#allocation5 + $0x10] sm:$0xff]  ;;  %v197_v46 = vld [vmem:[#allocation5 + $0x18] sm:$0xff]  ;;  %v214_v47 = vld [vmem:[#allocation5 + $0xa0] sm:$0xff] }
  0x32   :  { %v96_v49 = vld [vmem:[#allocation2 + $0xa0] sm:$0xff]  ;;  %v98_v50 = vld [vmem:[#allocation2 + $0xb0] sm:$0xff]  ;;  %390 = vmatprep.subr.bf16.mxu1 %v389_v38  ;;  %v215_v51 = vld [vmem:[#allocation5 + $0xa8] sm:$0xff]  ;;  %v395_v54 = vpack.c.bf16 %v197_v46, %v196_v45  ;;  %v111_v46 = vlaneseq }
  0x33   :  { %v101_v52 = vld [vmem:[#allocation2 + $0xc8] sm:$0xff]  ;;  %v103_v53 = vld [vmem:[#allocation2 + $0xd8] sm:$0xff]  ;;  %392 = vmatpush3.bf16.msra.mxu1 %v391_v43  ;;  %v397_v55 = vpack.c.bf16 %v215_v51, %v214_v47  ;;  %v198_v56 = vld [vmem:[#allocation5 + $0x20] sm:$0xff]  ;;  %v379_v58 = vpack.c.bf16 %v98_v50, %v96_v49 }
  0x34   :  { %368 = vmatpush1.bf16.msra.mxu0 %v367_v22  ;;  %394 = vmatprep.subr.bf16.mxu1 %v393_v44  ;;  %v199_v57 = vld [vmem:[#allocation5 + $0x28] sm:$0xff]  ;;  %v216_v59 = vld [vmem:[#allocation5 + $0xb0] sm:$0xff]  ;;  %v217_v60 = vld [vmem:[#allocation5 + $0xb8] sm:$0xff]  ;;  %v381_v61 = vpack.c.bf16 %v103_v53, %v101_v52  ;;  %v112_v47 = vshrl.u32 %v111_v46, 7 }
  0x35   :  { %370 = vmatprep.subr.bf16.mxu0 %v369_v23  ;;  %v100_v62 = vld [vmem:[#allocation2 + $0xc0] sm:$0xff]  ;;  %v102_v63 = vld [vmem:[#allocation2 + $0xd0] sm:$0xff]  ;;  %v105_v0 = vld [vmem:[#allocation2 + $0xe8] sm:$0xff]  ;;  %v399_v2 = vpack.c.bf16 %v199_v57, %v198_v56  ;;  %v401_v3 = vpack.c.bf16 %v217_v60, %v216_v59 }
  0x36   :  { %v107_v1 = vld [vmem:[#allocation2 + $0xf8] sm:$0xff]  ;;  %v200_v4 = vld [vmem:[#allocation5 + $0x30] sm:$0xff]  ;;  %v201_v5 = vld [vmem:[#allocation5 + $0x38] sm:$0xff]  ;;  %v383_v6 = vpack.c.bf16 %v102_v63, %v100_v62  ;;  %v117_v50 = vsub.s32 1, %v112_v47 }
  0x37   :  { %396 = vmatpush3.bf16.msra.mxu1 %v395_v54  ;;  %v218_v7 = vld [vmem:[#allocation5 + $0xc0] sm:$0xff]  ;;  %v219_v8 = vld [vmem:[#allocation5 + $0xc8] sm:$0xff]  ;;  %v385_v9 = vpack.c.bf16 %v107_v1, %v105_v0  ;;  %v104_v10 = vld [vmem:[#allocation2 + $0xe0] sm:$0xff]  ;;  %v403_v12 = vpack.c.bf16 %v201_v5, %v200_v4 }
  0x38   :  { %372 = vmatpush1.bf16.msra.mxu0 %v371_v29  ;;  %398 = vmatprep.subr.bf16.mxu1 %v397_v55  ;;  %v106_v11 = vld [vmem:[#allocation2 + $0xf0] sm:$0xff]  ;;  %v405_v13 = vpack.c.bf16 %v219_v8, %v218_v7  ;;  %v203_v15 = vld [vmem:[#allocation5 + $0x48] sm:$0xff]  ;;  %v220_v17 = vld [vmem:[#allocation5 + $0xd0] sm:$0xff] }
  0x39   :  { %374 = vmatprep.subr.bf16.mxu0 %v373_v31  ;;  %v202_v14 = vld [vmem:[#allocation5 + $0x40] sm:$0xff]  ;;  %v387_v16 = vpack.c.bf16 %v106_v11, %v104_v10  ;;  %v221_v18 = vld [vmem:[#allocation5 + $0xd8] sm:$0xff]  ;;  %v204_v21 = vld [vmem:[#allocation5 + $0x50] sm:$0xff] }
  0x3a   :  { %v407_v19 = vpack.c.bf16 %v203_v15, %v202_v14  ;;  %v409_v20 = vpack.c.bf16 %v221_v18, %v220_v17  ;;  %v205_v22 = vld [vmem:[#allocation5 + $0x58] sm:$0xff]  ;;  %v222_v23 = vld [vmem:[#allocation5 + $0xe0] sm:$0xff]  ;;  %v223_v24 = vld [vmem:[#allocation5 + $0xe8] sm:$0xff] }
  0x3b   :  { %400 = vmatpush3.bf16.msra.mxu1 %v399_v2  ;;  %v411_v25 = vpack.c.bf16 %v205_v22, %v204_v21  ;;  %v413_v26 = vpack.c.bf16 %v223_v24, %v222_v23  ;;  %v318_v28 = vld [vmem:[%s589_s1] ss:$0 sm:$0xff]  ;;  %v319_v29 = vld [vmem:[%s589_s1 + $0x1] ss:$0 sm:$0xff]  ;;  %v320_v33 = vld [vmem:[%s589_s1 + $0x2] ss:$0 sm:$0xff] }
  0x3c   :  { %376 = vmatpush1.bf16.msra.mxu0 %v375_v42  ;;  %402 = vmatprep.subr.bf16.mxu1 %v401_v3  ;;  %v206_v37 = vld [vmem:[#allocation5 + $0x60] sm:$0xff]  ;;  %v207_v38 = vld [vmem:[#allocation5 + $0x68] sm:$0xff]  ;;  %v224_v40 = vld [vmem:[#allocation5 + $0xf0] sm:$0xff]  ;;  %s514_s1 = smov [#allocation7]  }
  0x3d   :  { %378 = vmatprep.subr.bf16.mxu0 %v377_v48  ;;  %v415_v39 = vpack.c.bf16 %v207_v38, %v206_v37  ;;  %v225_v41 = vld [vmem:[#allocation5 + $0xf8] sm:$0xff]  ;;  %v208_v43 = vld [vmem:[#allocation5 + $0x70] sm:$0xff]  ;;  %v113_v48 = vsub.s32 0, %v112_v47  ;;  %v321_v60 = vld [vmem:[#allocation5 + $0x100] ss:$0 sm:$0xff]  ;;  %s308_s22 = sshll.u32 %s514_s1, 4  ;;  %s309_s22 = int_to_ptr.vmem [resolvable:$true] %s308_s22 }
  0x3e   :  { %v417_v42 = vpack.c.bf16 %v225_v41, %v224_v40  ;;  %v209_v44 = vld [vmem:[#allocation5 + $0x78] sm:$0xff]  ;;  %s477_s23 = scalar_lea.vmem %s309_s22, 128  ;;  %p482_p3 = scmp.lt.s32.totalorder %s309_s22, %s309_s22 }
  0x3f   :  { %404 = vmatpush3.bf16.msra.mxu1 %v403_v12  ;;  %v419_v45 = vpack.c.bf16 %v209_v44, %v208_v43  ;;  %v109_v49 = vld [vmem:[#allocation2 + $0x100] ss:$8 sm:$0x3]  ;;  %p478_p2 = scmp.ne.s32.totalorder %s309_s22, %s477_s23  ;;  %p483_p4 = scmp.lt.s32.totalorder %s477_s23, %s477_s23 }
  0x40   :  { %380 = vmatpush1.bf16.msra.mxu0 %v379_v58  ;;  %406 = vmatprep.subr.bf16.mxu1 %v405_v13  ;;  %v114_v51 = vrot.slane %v109_v49, %v113_v48  ;;  %v118_v52 = vrot.slane %v109_v49, %v117_v50 }
  0x41   :  { %382 = vmatprep.subr.bf16.mxu0 %v381_v61  ;;  %p484_p5 = por %p483_p4, %p482_p3 }
  0x43   :  { %408 = vmatpush3.bf16.msra.mxu1 %v407_v19  ;;  %p485_p6 = pnand %p484_p5, %p478_p2 }
  0x44   :  { %384 = vmatpush1.bf16.msra.mxu0 %v383_v6  ;;  %410 = vmatprep.subr.bf16.mxu1 %v409_v20 }
  0x45   :  { %386 = vmatprep.subr.bf16.mxu0 %v385_v9 }
  0x47   :  { %412 = vmatpush3.bf16.msra.mxu1 %v411_v25 }
  0x48   :  { %388 = vmatpush1.bf16.msra.mxu0 %v387_v16  ;;  %414 = vmatprep.subr.bf16.mxu1 %v413_v26 }
  0x4b   :  { %416 = vmatpush3.bf16.msra.mxu1 %v415_v39 }
  0x4c   :  { %418 = vmatprep.subr.bf16.mxu1 %v417_v42 }
  0x4f   :  { %420 = vmatpush3.bf16.msra.mxu1 %v419_v45 }
  0xa8   :  { %v51_v27 = vpop.permute.xlu0 %50 }
  0xa9   :  { %v57_v31 = vmul.f32 %v318_v28, %v51_v27 }
  0xad   :  { %v61_v30 = vpop.permute.xlu0 %60 }
  0xae   :  { %v67_v32 = vmul.f32 %v319_v29, %v61_v30 }
  0xb0   :  { %v68_v34 = vadd.f32 %v67_v32, %v57_v31 }
  0xb2   :  { %v74_v35 = vadd.f32 %v320_v33, %v68_v34 }
  0xb4   :  { %v75_v36 = vmax.f32 %v74_v35, 0.0 }
  0xb6   :  { %186 = vmatmul.mubr.f32.vlgmr.msra.gmra.mrb[0].mxu0 %v75_v36 }
 0x189   :  { %v187_v53 = vpop.f32.mrb[0].mxu0 }
 0x18a   :  { %v188_v54 = vadd.f32 %v187_v53, %v114_v51  ;;  %v189_v55 = vpop.f32.mrb[1].mxu0 }
 0x18b   :  { %v190_v56 = vadd.f32 %v189_v55, %v118_v52 }
 0x18c   :  { %v192_v58 = vmax.f32 %v188_v54, 0.0 }
 0x18d   :  { %v193_v57 = vmax.f32 %v190_v56, 0.0 }
 0x18f   :  { %295 = vmatprep.mubr.f32.mxu1 %v193_v57 }
 0x190   :  { %296 = vmatmul.mubr.f32.vlgmr.msra.gmra.mrb[0].mxu1 %v192_v58 }
 0x263   :  { %v354_v59 = vpop.f32.mrb[0].mxu1 }
 0x264   :  { %v355_v61 = vpop.f32.mrb[1].mxu1 }
 0x265   :  { %v356_v62 = vadd.f32 %v355_v61, %v354_v59 }
 0x267   :  { %v298_v63 = vadd.f32 %v356_v62, %v321_v60 }
 0x269   :  { %301 = vst [vmem:[#allocation7] sm:$0xff] %v298_v63 }
 0x26a   :  { %488 = shalt.err (!%p485_p6)
}
 0x26b   :  { %s489_s26 = scalar_lea.hbm %s592_s4, 128 }
 0x26c   :  { %p490_p7 = scmp.ne.s32.totalorder %s592_s4, %s489_s26  ;;  %p493_p8 = scmp.lt.u32.totalorder %s489_s26, %s592_s4 }
 0x26e   :  { %p495_p9 = pnand %p493_p8, %p490_p7 }
 0x270   :  { %498 = shalt.err (!%p495_p9)
}
 0x271   :  { %311 = dma.vmem_to_hbm [thread:$0]  %s309_s22, 128, %s592_s4, [#allocation4]  }
 0x272   :  { %503 = dma.done.wait [#allocation4], 128  }
 0x273   :  { %504 = vsyncadd [#allocation4], 4294967168 }
 0x274   :  { %315 = vsyncpa [#allocation3], 1 }
 0x275   :  { %316 = vsyncpa [#allocation6], 1 }
 0x276   :  { %317 = vsyncpa [#allocation4], 1 }

</bundles_post_ra>
